<compile_context>
chip_gen: v7x
topology: tpu7x:2x2x1
jax: 0.10.0
libtpu: 0.0.40
codegen_flags: <defaults>
</compile_context>

<pallas_src>
import math
import functools

import jax
import jax.numpy as jnp
from jax.experimental import pallas as pl
from jax.experimental.pallas import tpu as pltpu


def make_pe(d_model, max_len=5000, dtype=jnp.float32):
    """Deterministic sinusoidal table, identical to the PyTorch __init__."""
    position = jnp.arange(max_len, dtype=jnp.float32)[:, None]          # (max_len, 1)
    div_term = jnp.exp(
        jnp.arange(0, d_model, 2, dtype=jnp.float32) * (-math.log(10000.0) / d_model)
    )                                                                    # (d_model/2,)
    pe = jnp.zeros((max_len, d_model), dtype=jnp.float32)
    pe = pe.at[:, 0::2].set(jnp.sin(position * div_term))
    pe = pe.at[:, 1::2].set(jnp.cos(position * div_term))
    return pe.astype(dtype)


def _add_pe_kernel(x_ref, pe_ref, o_ref):
    # x_ref: (TB, TC); pe_ref: (1, TC) broadcast over the batch rows.
    o_ref[...] = x_ref[...] + pe_ref[...]


def _add_pe_dropout_kernel(x_ref, pe_ref, mask_ref, o_ref):
    # mask_ref holds the pre-scaled inverted-dropout mask: values in {0, 1/(1-p)}.
    o_ref[...] = (x_ref[...] + pe_ref[...]) * mask_ref[...]


def _row_tile(batch, itemsize):
    # 8 sublanes for f32, 16 for bf16, 32 for int8; full batch if it is small.
    sublane = max(8, 32 // max(itemsize, 1))
    return batch if batch <= sublane else sublane


def _col_tile(cols, row_tile, itemsize):
    # ~2 MiB per x block: big enough to hide per-step overhead, small enough
    # that double-buffered x/out/mask/pe stay well under v7x's scoped VMEM.
    target_elems = (2 * 1024 * 1024) // max(itemsize, 1)
    tc = max(128, (target_elems // max(row_tile, 1)) // 128 * 128)
    if tc >= cols:
        tc = cols  # full extent (128-multiple requirement waived for full dims)
    return tc


@functools.partial(jax.jit, static_argnames=("p", "training"))
def positional_encoding(x, pe, key, *, p=0.1, training=False):
    B, S, D = x.shape
    max_len = pe.shape[0]
    SD = S * D
    itemsize = jnp.dtype(x.dtype).itemsize

    # Lane-dense 2D views (free reshapes of contiguous arrays).
    x2 = x.reshape(B, SD)
    pe_flat = pe.astype(x.dtype).reshape(1, max_len * D)

    tb = _row_tile(B, itemsize)
    tc = _col_tile(SD, tb, itemsize)
    grid = (pl.cdiv(B, tb), pl.cdiv(SD, tc))

    x_spec = pl.BlockSpec((tb, tc), lambda b, c: (b, c))
    pe_spec = pl.BlockSpec((1, tc), lambda b, c: (0, c))
    mask_spec = pl.BlockSpec((tb, tc), lambda b, c: (b, c))
    out_spec = pl.BlockSpec((tb, tc), lambda b, c: (b, c))

    cparams = pltpu.CompilerParams(
        dimension_semantics=("parallel", "parallel"),
        vmem_limit_bytes=32 * 1024 * 1024,
    )

    if training and p > 0.0:
        keep = jax.random.bernoulli(key, 1.0 - p, (B, SD))
        mask = keep.astype(x.dtype) * jnp.asarray(1.0 / (1.0 - p), dtype=x.dtype)
        out2 = pl.pallas_call(
            _add_pe_dropout_kernel,
            out_shape=jax.ShapeDtypeStruct((B, SD), x.dtype),
            grid=grid,
            in_specs=[x_spec, pe_spec, mask_spec],
            out_specs=out_spec,
            compiler_params=cparams,
        )(x2, pe_flat, mask)
    else:
        out2 = pl.pallas_call(
            _add_pe_kernel,
            out_shape=jax.ShapeDtypeStruct((B, SD), x.dtype),
            grid=grid,
            in_specs=[x_spec, pe_spec],
            out_specs=out_spec,
            compiler_params=cparams,
        )(x2, pe_flat)

    return out2.reshape(B, S, D)


if __name__ == "__main__":
    d_model = 32
    batch, seq_len = 2, 8
    p = 0.1

    key = jax.random.PRNGKey(0)
    x_key, drop_key = jax.random.split(key)
    x = jax.random.normal(x_key, (batch, seq_len, d_model), dtype=jnp.float32)

    pe = make_pe(d_model, max_len=5000)

    # Eval mode (dropout is identity): must match the reference add exactly.
    out = positional_encoding(x, pe, drop_key, p=p, training=False)
    out = jax.block_until_ready(out)
    ref = x + pe[None, :seq_len, :]
    assert out.shape == x.shape and out.dtype == x.dtype
    assert jnp.allclose(out, ref, atol=1e-6), "eval-mode mismatch vs reference"

    # Train mode: every element is either dropped (0) or ref / (1 - p).
    out_tr = positional_encoding(x, pe, drop_key, p=p, training=True)
    out_tr = jax.block_until_ready(out_tr)
    scaled = ref / (1.0 - p)
    ok = jnp.logical_or(out_tr == 0.0, jnp.isclose(out_tr, scaled, atol=1e-5))
    assert out_tr.shape == x.shape
    assert bool(jnp.all(jnp.isfinite(out_tr)))
    assert bool(jnp.all(ok)), "train-mode dropout values inconsistent"

    print("KERNEL_OK")
</pallas_src>

<mosaic_0001>
module attributes {stable_mosaic.version = 11 : i64} {
  func.func @_add_pe_kernel(%arg0: i32, %arg1: i32, %arg2: memref<2x256xf32, #tpu.memory_space<vmem>>, %arg3: memref<1x256xf32, #tpu.memory_space<vmem>>, %arg4: memref<2x256xf32, #tpu.memory_space<vmem>>) attributes {dimension_semantics = [#tpu.dimension_semantics<parallel>, #tpu.dimension_semantics<parallel>], iteration_bounds = array<i64: 1, 1>, scalar_prefetch = 0 : i64, scratch_operands = 0 : i64, tpu.core_type = #tpu.core_type<tc>, window_params = [{transform_indices = @transform_0, window_bounds = array<i64: 2, 256>}, {transform_indices = @transform_1, window_bounds = array<i64: 1, 256>}, {transform_indices = @transform_2, window_bounds = array<i64: 2, 256>}]} {
    %c0 = arith.constant 0 : index
    %c0_0 = arith.constant 0 : index
    %0 = vector.load %arg2[%c0, %c0_0] : memref<2x256xf32, #tpu.memory_space<vmem>>, vector<2x256xf32>
    %c0_1 = arith.constant 0 : index
    %c0_2 = arith.constant 0 : index
    %1 = vector.load %arg3[%c0_1, %c0_2] : memref<1x256xf32, #tpu.memory_space<vmem>>, vector<1x256xf32>
    %2 = vector.broadcast %1 : vector<1x256xf32> to vector<2x256xf32>
    %3 = arith.addf %0, %2 : vector<2x256xf32>
    %c0_3 = arith.constant 0 : index
    %c0_4 = arith.constant 0 : index
    %4 = vector.load %arg4[%c0_3, %c0_4] : memref<2x256xf32, #tpu.memory_space<vmem>>, vector<2x256xf32>
    tpu.vector_store %arg4[%c0_3, %c0_4], %3 {strides = array<i32>} : memref<2x256xf32, #tpu.memory_space<vmem>>, vector<2x256xf32>,
    return
  }
  func.func @transform_0(%arg0: i32, %arg1: i32) -> (i32, i32) {
    %c0_i32 = arith.constant 0 : i32
    return %arg0, %arg1 : i32, i32
  }
  func.func @transform_1(%arg0: i32, %arg1: i32) -> (i32, i32) {
    %c0_i32 = arith.constant 0 : i32
    %c0_i32_0 = arith.constant 0 : i32
    return %c0_i32, %arg1 : i32, i32
  }
  func.func @transform_2(%arg0: i32, %arg1: i32) -> (i32, i32) {
    %c0_i32 = arith.constant 0 : i32
    return %arg0, %arg1 : i32, i32
  }
}

</mosaic_0001>

<bundles_post_ra>
// kernel: positional_encoding.1
= control target key start
LH: loop header
LB: loop body
LE: loop exit
PB: predicated region body
PF: predicated region fallthrough
CT: control target
= control target key end

     0   :  { %v14_v0 = vlaneseq  ;;  %v38_v1 = vmov 1983009808   ;;  %s63_s1 = inlined_call_operand.vmem [shape: f32[1,160000], index: 1, kind: input, shape index: {}]   ;;  %s64_s0 = inlined_call_operand.vmem [shape: f32[2,256], index: 0, kind: input, shape index: {}]   ;;  %s65_s2 = inlined_call_operand.vmem [shape: f32[2,256], index: 2, kind: output, shape index: {}]  }
   0x1   :  { %v24_v2 = vunpack.c.l.s4 %v38_v1  ;;  %v12_v4 = vld [vmem:[%s63_s1] sm:$0x3] }
   0x2   :  { %v15_v3 = vshrl.u32 %v14_v0, 7  ;;  %v11_v12 = vld [vmem:[%s64_s0] sm:$0xf] }
   0x3   :  { %v25_v5 = vunpack.c.0.s8 %v24_v2 }
   0x4   :  { %v16_v6 = vsub.s32 0, %v15_v3  ;;  %v20_v7 = vsub.s32 1, %v15_v3 }
   0x5   :  { %v28_v10 = vsub.s32 %v25_v5, %v15_v3 }
   0x6   :  { %v17_v8 = vrot.slane %v12_v4, %v16_v6  ;;  %v21_v9 = vrot.slane %v12_v4, %v20_v7 }
   0x8   :  { %v22_v11 = vcombine.low %v17_v8, %v21_v9 }
   0xa   :  { %v29_v13 = vrot.slane %v22_v11, %v28_v10 }
   0xc   :  { %v31_v14 = vadd.f32 %v29_v13, %v11_v12 }
   0xe   :  { %32 = vst [vmem:[%s65_s2] sm:$0xf] %v31_v14 }

</bundles_post_ra>
